<compile_context>
chip_gen: v6e
topology: v6e:2x2x1
jax: 0.10.0
libtpu: 0.0.40
codegen_flags: <defaults>
</compile_context>

<pallas_src>
import functools
import math
from typing import NamedTuple, Tuple

import jax
import jax.numpy as jnp
from jax.experimental import pallas as pl
from jax.experimental.pallas import tpu as pltpu


def _round_up(x, m):
    return (x + m - 1) // m * m


def _vmem_capacity_bytes():
    """Physical VMEM per TensorCore; conservative (v7x) fallback."""
    try:
        info = pltpu.get_tpu_info()
        cap = getattr(info, "vmem_capacity_bytes", None)
        if cap:
            return int(cap)
    except Exception:
        pass
    return 64 * 1024 * 1024


# --------------------------------------------------------------------------
# Kernel body: fused Linear (+ReLU) chain on one row tile.
#   refs = (w0, b0, w1, b1, ..., w{L-1}, b{L-1}, out_ref)
# --------------------------------------------------------------------------
def _mlp_kernel(num_layers, x_ref, *refs):
    out_ref = refs[-1]
    param_refs = refs[:-1]

    h = x_ref[...]  # native dtype (f32 or bf16) -> MXU operand
    for i in range(num_layers):
        w_ref = param_refs[2 * i]
        b_ref = param_refs[2 * i + 1]
        acc = jnp.dot(h, w_ref[...], preferred_element_type=jnp.float32)
        acc = acc + b_ref[...]                     # bias is stored as f32
        if i < num_layers - 1:
            acc = jnp.maximum(acc, 0.0)            # ReLU on all but last layer
            h = acc.astype(w_ref.dtype)            # back to operand dtype
        else:
            out_ref[...] = acc.astype(out_ref.dtype)


# --------------------------------------------------------------------------
# One-time parameter preparation (padding hoisted out of the forward pass).
# --------------------------------------------------------------------------
class MLPParams(NamedTuple):
    weights: Tuple[jnp.ndarray, ...]   # (rows, cols): first rows = in_dim (unpadded),
    biases: Tuple[jnp.ndarray, ...]    # hidden cols padded to 128, last cols = out_dim
    in_dim: int
    out_dim: int


def prepare_mlp_params(weights, biases, compute_dtype=None):
    """weights[i]: (in_i, out_i) (transpose of PyTorch (out,in)); biases[i]: (out_i,).

    Zero-pads hidden feature dims up to multiples of 128 (exact numerics).
    The first layer's input dim and the last layer's output dim stay unpadded
    so activations need no HBM-side padding or cropping.
    """
    num_layers = len(weights)
    assert len(biases) == num_layers
    in_dim = weights[0].shape[0]
    out_dim = weights[-1].shape[1]

    col_dims = [w.shape[1] for w in weights]
    col_pad = [_round_up(d, 128) for d in col_dims[:-1]] + [out_dim]
    row_pad = [in_dim] + col_pad[:-1]

    wp, bp = [], []
    for i, (w, b) in enumerate(zip(weights, biases)):
        wdt = compute_dtype if compute_dtype is not None else w.dtype
        wpad = jnp.zeros((row_pad[i], col_pad[i]), wdt)
        wpad = wpad.at[: w.shape[0], : w.shape[1]].set(w.astype(wdt))
        bpad = jnp.zeros((1, col_pad[i]), jnp.float32)   # bias added in f32 acc
        bpad = bpad.at[0, : b.shape[0]].set(b.astype(jnp.float32))
        wp.append(wpad)
        bp.append(bpad)
    return MLPParams(tuple(wp), tuple(bp), in_dim, out_dim)


# --------------------------------------------------------------------------
# Forward pass.
# --------------------------------------------------------------------------
def mlp_forward(x, params: MLPParams, *, max_tm=8192, gridless_max_rows=256):
    num_layers = len(params.weights)
    in_dim, out_dim = params.in_dim, params.out_dim
    assert x.shape[-1] == in_dim

    lead_shape = x.shape[:-1]
    M = math.prod(lead_shape) if lead_shape else 1

    compute_dtype = params.weights[0].dtype
    out_dtype = x.dtype
    x2d = x.reshape(M, in_dim).astype(compute_dtype)

    flat_params = []
    for w, b in zip(params.weights, params.biases):
        flat_params.extend([w, b])

    kernel = functools.partial(_mlp_kernel, num_layers)

    # ---------------- small-problem fast path: gridless, fully VMEM-resident
    if M <= gridless_max_rows:
        vmem = pltpu.MemorySpace.VMEM
        out = pl.pallas_call(
            kernel,
            out_shape=jax.ShapeDtypeStruct((M, out_dim), out_dtype),
            in_specs=[pl.BlockSpec(memory_space=vmem)] * (1 + len(flat_params)),
            out_specs=pl.BlockSpec(memory_space=vmem),
        )(x2d, *flat_params)
        return out.reshape(*lead_shape, out_dim)

    # ---------------- tiled / pipelined path over the row dim ----------------
    itemsize = jnp.dtype(compute_dtype).itemsize
    out_itemsize = jnp.dtype(out_dtype).itemsize
    sub = {1: 32, 2: 16, 4: 8}.get(itemsize, 8)        # sublane multiple
    param_bytes = sum(a.size * a.dtype.itemsize for a in flat_params)
    max_dim = max([in_dim] + [w.shape[1] for w in params.weights])

    vmem_cap = _vmem_capacity_bytes()
    budget = int(0.72 * vmem_cap)   # ~46 MiB on v7x, ~92 MiB on v5e/v6e

    def vmem_needed(t):
        io = 2 * t * in_dim * itemsize + 2 * t * out_dim * out_itemsize  # dbl-buffered tiles
        inter = 3 * t * max_dim * 4          # f32 accumulators + cast activations headroom
        return 2 * param_bytes + io + inter  # params conservatively counted double-buffered

    # Grow the row tile to fill the budget (per-grid-step overhead amortization),
    # then shrink if somehow still over.
    tm = 256
    while tm * 2 <= max_tm and vmem_needed(tm * 2) <= budget:
        tm *= 2
    while tm > sub and vmem_needed(tm) > budget:
        tm //= 2
    tm = max(tm, sub)
    # Keep >= 2 row tiles so the ("parallel",) axis can split across 2 TCs (v7x).
    tm = min(tm, max(_round_up((M + 1) // 2, sub), sub))

    n_tiles = -(-M // tm)   # cdiv: no row padding; edge block is masked on write

    in_specs = [pl.BlockSpec((tm, in_dim), lambda i: (i, 0))]
    for w, b in zip(params.weights, params.biases):
        # constant block index -> stays resident in VMEM across grid steps
        in_specs.append(pl.BlockSpec(w.shape, lambda i: (0, 0)))
        in_specs.append(pl.BlockSpec(b.shape, lambda i: (0, 0)))

    vmem_limit = min(int(0.80 * vmem_cap),              # < physical ceiling (v7x headroom)
                     max(32 * 1024 * 1024, int(1.3 * vmem_needed(tm))))

    out = pl.pallas_call(
        kernel,
        out_shape=jax.ShapeDtypeStruct((M, out_dim), out_dtype),
        grid=(n_tiles,),
        in_specs=in_specs,
        out_specs=pl.BlockSpec((tm, out_dim), lambda i: (i, 0)),
        compiler_params=pltpu.CompilerParams(
            dimension_semantics=("parallel",),
            vmem_limit_bytes=vmem_limit,
        ),
    )(x2d, *flat_params)
    return out.reshape(*lead_shape, out_dim)


# --------------------------------------------------------------------------
# Init & reference (for the self-test).
# --------------------------------------------------------------------------
def init_mlp_params(key, input_dim, hidden_dim, output_dim, num_layers,
                    dtype=jnp.float32):
    """Deterministic init mirroring nn.Linear shapes (weights stored transposed)."""
    h = [hidden_dim] * (num_layers - 1)
    dims_in = [input_dim] + h
    dims_out = h + [output_dim]

    weights, biases = [], []
    for n, k in zip(dims_in, dims_out):
        key, kw, kb = jax.random.split(key, 3)
        bound = 1.0 / (n ** 0.5)   # PyTorch default uniform bound
        w = jax.random.uniform(kw, (n, k), dtype, minval=-bound, maxval=bound)
        b = jax.random.uniform(kb, (k,), dtype, minval=-bound, maxval=bound)
        weights.append(w)
        biases.append(b)
    return weights, biases


def mlp_reference(x, weights, biases):
    num_layers = len(weights)
    h = x
    for i, (w, b) in enumerate(zip(weights, biases)):
        h = h @ w + b
        if i < num_layers - 1:
            h = jnp.maximum(h, 0.0)
    return h


if __name__ == "__main__":
    key = jax.random.PRNGKey(0)

    # MLP(input_dim=32, hidden_dim=64, output_dim=16, num_layers=3)
    input_dim, hidden_dim, output_dim, num_layers = 32, 64, 16, 3
    kx1, kx2, kp = jax.random.split(key, 3)
    weights, biases = init_mlp_params(kp, input_dim, hidden_dim, output_dim,
                                      num_layers)

    # Parameter padding is done ONCE here (hoisted out of the forward pass).
    params_f32 = prepare_mlp_params(weights, biases)

    # Small case (batch=2, seq=8 -> M=16): gridless, fully VMEM-resident path.
    x_small = jax.random.normal(kx1, (2, 8, input_dim), dtype=jnp.float32)
    out_small = jax.block_until_ready(mlp_forward(x_small, params_f32))
    ref_small = mlp_reference(x_small, weights, biases)
    assert out_small.shape == (2, 8, output_dim)
    assert jnp.allclose(out_small, ref_small, atol=1e-4, rtol=1e-4), \
        "small-path mismatch vs reference"

    # Larger case (batch=2, seq=300 -> M=600): tiled grid path, unpadded
    # activations / output, >=2 row tiles, partial edge block masked on write.
    x_big = jax.random.normal(kx2, (2, 300, input_dim), dtype=jnp.float32)
    out_big = jax.block_until_ready(mlp_forward(x_big, params_f32))
    ref_big = mlp_reference(x_big, weights, biases)
    assert out_big.shape == (2, 300, output_dim)
    assert jnp.allclose(out_big, ref_big, atol=1e-4, rtol=1e-4), \
        "grid-path mismatch vs reference"

    # Optional bf16 operand path (f32 accumulation kept inside the kernel).
    params_bf16 = prepare_mlp_params(weights, biases, compute_dtype=jnp.bfloat16)
    out_bf16 = jax.block_until_ready(mlp_forward(x_big, params_bf16))
    assert out_bf16.shape == (2, 300, output_dim)
    assert jnp.allclose(out_bf16, ref_big, atol=1e-1, rtol=1e-1), \
        "bf16-path mismatch vs reference (loose tolerance)"

    print("KERNEL_OK")
</pallas_src>

<mosaic_0001>
module attributes {stable_mosaic.version = 11 : i64} {
  func.func @_mlp_kernel(%arg0: memref<16x32xf32, #tpu.memory_space<vmem>>, %arg1: memref<32x128xf32, #tpu.memory_space<vmem>>, %arg2: memref<1x128xf32, #tpu.memory_space<vmem>>, %arg3: memref<128x128xf32, #tpu.memory_space<vmem>>, %arg4: memref<1x128xf32, #tpu.memory_space<vmem>>, %arg5: memref<128x16xf32, #tpu.memory_space<vmem>>, %arg6: memref<1x16xf32, #tpu.memory_space<vmem>>, %arg7: memref<16x16xf32, #tpu.memory_space<vmem>>) attributes {dimension_semantics = [], scalar_prefetch = 0 : i64, scratch_operands = 0 : i64, tpu.core_type = #tpu.core_type<tc>} {
    %c0 = arith.constant 0 : index
    %c0_0 = arith.constant 0 : index
    %0 = vector.load %arg0[%c0, %c0_0] : memref<16x32xf32, #tpu.memory_space<vmem>>, vector<16x32xf32>
    %c0_1 = arith.constant 0 : index
    %c0_2 = arith.constant 0 : index
    %1 = vector.load %arg1[%c0_1, %c0_2] : memref<32x128xf32, #tpu.memory_space<vmem>>, vector<32x128xf32>
    %cst = arith.constant dense<0.000000e+00> : vector<16x128xf32>
    %2 = tpu.matmul %0, %1, %cst {dimension_numbers = #tpu.dot_dimension_numbers<[1], [0], [0], [1], [0, 0, 1, 1], [], []>} : vector<16x32xf32>, vector<32x128xf32>, vector<16x128xf32> -> vector<16x128xf32>
    %c0_3 = arith.constant 0 : index
    %c0_4 = arith.constant 0 : index
    %3 = vector.load %arg2[%c0_3, %c0_4] : memref<1x128xf32, #tpu.memory_space<vmem>>, vector<1x128xf32>
    %4 = vector.broadcast %3 : vector<1x128xf32> to vector<16x128xf32>
    %5 = arith.addf %2, %4 : vector<16x128xf32>
    %cst_5 = arith.constant 0.000000e+00 : f32
    %6 = vector.broadcast %cst_5 : f32 to vector<16x128xf32>
    %7 = arith.maximumf %5, %6 : vector<16x128xf32>
    %c0_6 = arith.constant 0 : index
    %c0_7 = arith.constant 0 : index
    %8 = vector.load %arg3[%c0_6, %c0_7] : memref<128x128xf32, #tpu.memory_space<vmem>>, vector<128x128xf32>
    %cst_8 = arith.constant dense<0.000000e+00> : vector<16x128xf32>
    %9 = tpu.matmul %7, %8, %cst_8 {dimension_numbers = #tpu.dot_dimension_numbers<[1], [0], [0], [1], [0, 0, 1, 1], [], []>} : vector<16x128xf32>, vector<128x128xf32>, vector<16x128xf32> -> vector<16x128xf32>
    %c0_9 = arith.constant 0 : index
    %c0_10 = arith.constant 0 : index
    %10 = vector.load %arg4[%c0_9, %c0_10] : memref<1x128xf32, #tpu.memory_space<vmem>>, vector<1x128xf32>
    %11 = vector.broadcast %10 : vector<1x128xf32> to vector<16x128xf32>
    %12 = arith.addf %9, %11 : vector<16x128xf32>
    %cst_11 = arith.constant 0.000000e+00 : f32
    %13 = vector.broadcast %cst_11 : f32 to vector<16x128xf32>
    %14 = arith.maximumf %12, %13 : vector<16x128xf32>
    %c0_12 = arith.constant 0 : index
    %c0_13 = arith.constant 0 : index
    %15 = vector.load %arg5[%c0_12, %c0_13] : memref<128x16xf32, #tpu.memory_space<vmem>>, vector<128x16xf32>
    %cst_14 = arith.constant dense<0.000000e+00> : vector<16x16xf32>
    %16 = tpu.matmul %14, %15, %cst_14 {dimension_numbers = #tpu.dot_dimension_numbers<[1], [0], [0], [1], [0, 0, 1, 1], [], []>} : vector<16x128xf32>, vector<128x16xf32>, vector<16x16xf32> -> vector<16x16xf32>
    %c0_15 = arith.constant 0 : index
    %c0_16 = arith.constant 0 : index
    %17 = vector.load %arg6[%c0_15, %c0_16] : memref<1x16xf32, #tpu.memory_space<vmem>>, vector<1x16xf32>
    %18 = vector.broadcast %17 : vector<1x16xf32> to vector<16x16xf32>
    %19 = arith.addf %16, %18 : vector<16x16xf32>
    %c0_17 = arith.constant 0 : index
    %c0_18 = arith.constant 0 : index
    %20 = vector.load %arg7[%c0_17, %c0_18] : memref<16x16xf32, #tpu.memory_space<vmem>>, vector<16x16xf32>
    tpu.vector_store %arg7[%c0_17, %c0_18], %19 {strides = array<i32>} : memref<16x16xf32, #tpu.memory_space<vmem>>, vector<16x16xf32>,
    return
  }
}

</mosaic_0001>

<bundles_post_ra>
// kernel: tpu_custom_call.1
= control target key start
LH: loop header
LB: loop body
LE: loop exit
PB: predicated region body
PF: predicated region fallthrough
CT: control target
= control target key end

     0   :  { %12 = vsyncpa [#allocation3], 0  ;;  %s701_s0 = inlined_call_operand.vmem [shape: f32[16,32], index: 0, kind: input, shape index: {}]   ;;  %s702_s1 = inlined_call_operand.hbm [shape: f32[32,128], index: 1, kind: input, shape index: {}]   ;;  %s703_s2 = inlined_call_operand.vmem [shape: f32[1,128], index: 2, kind: input, shape index: {}]   ;;  %s704_s3 = inlined_call_operand.vmem [shape: f32[128,128], index: 3, kind: input, shape index: {}]   ;;  %s705_s4 = inlined_call_operand.vmem [shape: f32[1,128], index: 4, kind: input, shape index: {}]   ;;  %s706_s5 = inlined_call_operand.vmem [shape: f32[128,16], index: 5, kind: input, shape index: {}]   ;;  %s707_s6 = inlined_call_operand.vmem [shape: f32[1,16], index: 6, kind: input, shape index: {}]   ;;  %s708_s7 = inlined_call_operand.hbm [shape: f32[16,16], index: 7, kind: output, shape index: {}]  }
   0x1   :  { %13 = vsyncpa [#allocation4], 0  ;;  %s532_s24 = smov [#allocation2]  }
   0x2   :  { %s21_s25 = sshll.u32 %s532_s24, 4  ;;  %s22_s25 = int_to_ptr.vmem [resolvable:$true] %s21_s25 }
   0x3   :  { %s496_s26 = scalar_lea.vmem %s22_s25, 512  ;;  %p501_p1 = scmp.lt.s32.totalorder %s22_s25, %s22_s25 }
   0x4   :  { %p497_p0 = scmp.ne.s32.totalorder %s22_s25, %s496_s26  ;;  %p502_p2 = scmp.lt.s32.totalorder %s496_s26, %s496_s26 }
   0x6   :  { %p503_p3 = por %p502_p2, %p501_p1 }
   0x8   :  { %p504_p4 = pnand %p503_p3, %p497_p0 }
   0xa   :  { %507 = shalt.err (!%p504_p4)
}
   0xb   :  { %s533_s27 = smov 128   ;;  %s534_s28 = smov 8  }
   0xc   :  { %27 = dma.hbm_to_vmem [thread:$0]  %s702_s1, 512, %s22_s25, [#allocation3], %s533_s27, %s533_s27, %s534_s28  }
   0xd   :  { %528 = dma.done.wait [#allocation3], 512  }
   0xe   :  { %529 = vsyncadd [#allocation3], 4294966784  ;;  %vm54_vm0 = vcmask 261120   ;;  %v46_v0 = vld [vmem:[#allocation2 + $0x18] sm:$0xff]  ;;  %v45_v1 = vld [vmem:[#allocation2 + $0x10] sm:$0xff]  ;;  %vm336_vm1 = vcmask 130048  }
   0xf   :  { %403 = vmatprep.subr.mxu0 %v46_v0  ;;  %v41_v2 = vld [vmem:[%s701_s0] sm:$0xff]  ;;  %v44_v3 = vld [vmem:[#allocation2 + $0x8] sm:$0xff]  ;;  %v153_v4 = vld [vmem:[%s704_s3 + $0x78] sm:$0xff] }
  0x10   :  { %404 = vmatpush3.msra.mxu0 %v46_v0  ;;  %411 = vmatprep.mubr.msk.f32.mxu0 %vm54_vm0, %v41_v2  ;;  %v152_v5 = vld [vmem:[%s704_s3 + $0x70] sm:$0xff]  ;;  %v43_v6 = vld [vmem:[#allocation2] sm:$0xff]  ;;  %v151_v7 = vld [vmem:[%s704_s3 + $0x68] sm:$0xff] }
  0x11   :  { %405 = vmatprep.subr.mxu0 %v45_v1  ;;  %414 = vmatprep.subr.mxu1 %v153_v4  ;;  %v42_v8 = vld [vmem:[%s701_s0 + $0x8] sm:$0xff]  ;;  %v150_v9 = vld [vmem:[%s704_s3 + $0x60] sm:$0xff]  ;;  %v149_v10 = vld [vmem:[%s704_s3 + $0x58] sm:$0xff] }
  0x12   :  { %406 = vmatpush3.msra.mxu0 %v45_v1  ;;  %415 = vmatpush3.msra.mxu1 %v153_v4  ;;  %v148_v11 = vld [vmem:[%s704_s3 + $0x50] sm:$0xff]  ;;  %v147_v12 = vld [vmem:[%s704_s3 + $0x48] sm:$0xff]  ;;  %v146_v13 = vld [vmem:[%s704_s3 + $0x40] sm:$0xff] }
  0x13   :  { %407 = vmatprep.subr.mxu0 %v44_v3  ;;  %416 = vmatprep.subr.mxu1 %v152_v5  ;;  %v145_v14 = vld [vmem:[%s704_s3 + $0x38] sm:$0xff]  ;;  %v144_v15 = vld [vmem:[%s704_s3 + $0x30] sm:$0xff]  ;;  %v143_v16 = vld [vmem:[%s704_s3 + $0x28] sm:$0xff] }
  0x14   :  { %408 = vmatpush3.msra.mxu0 %v44_v3  ;;  %417 = vmatpush3.msra.mxu1 %v152_v5  ;;  %v142_v17 = vld [vmem:[%s704_s3 + $0x20] sm:$0xff]  ;;  %v141_v18 = vld [vmem:[%s704_s3 + $0x18] sm:$0xff]  ;;  %v140_v19 = vld [vmem:[%s704_s3 + $0x10] sm:$0xff] }
  0x15   :  { %409 = vmatprep.subr.mxu0 %v43_v6  ;;  %418 = vmatprep.subr.mxu1 %v151_v7  ;;  %v139_v20 = vld [vmem:[%s704_s3 + $0x8] sm:$0xff]  ;;  %v138_v21 = vld [vmem:[%s704_s3] sm:$0xff]  ;;  %v253_v22 = vld [vmem:[%s706_s5 + $0x78] sm:$0xff] }
  0x16   :  { %410 = vmatpush3.msra.mxu0 %v43_v6  ;;  %419 = vmatpush3.msra.mxu1 %v151_v7  ;;  %v252_v23 = vld [vmem:[%s706_s5 + $0x70] sm:$0xff]  ;;  %v251_v24 = vld [vmem:[%s706_s5 + $0x68] sm:$0xff]  ;;  %v250_v25 = vld [vmem:[%s706_s5 + $0x60] sm:$0xff] }
  0x17   :  { %412 = vmatmul.mubr.msk.f32.vlgmr.msra.gmra.mxu0 %vm54_vm0, %v42_v8  ;;  %420 = vmatprep.subr.mxu1 %v150_v9  ;;  %v249_v26 = vld [vmem:[%s706_s5 + $0x58] sm:$0xff]  ;;  %v248_v27 = vld [vmem:[%s706_s5 + $0x50] sm:$0xff]  ;;  %v247_v28 = vld [vmem:[%s706_s5 + $0x48] sm:$0xff] }
  0x18   :  { %421 = vmatpush3.msra.mxu1 %v150_v9  ;;  %449 = vmatprep.subr.mxu0 %v253_v22  ;;  %v246_v29 = vld [vmem:[%s706_s5 + $0x40] sm:$0xff]  ;;  %v245_v30 = vld [vmem:[%s706_s5 + $0x38] sm:$0xff]  ;;  %v244_v31 = vld [vmem:[%s706_s5 + $0x30] sm:$0xff] }
  0x19   :  { %422 = vmatprep.subr.mxu1 %v149_v10  ;;  %450 = vmatpush3.msra.mxu0 %v253_v22  ;;  %v243_v32 = vld [vmem:[%s706_s5 + $0x28] sm:$0xff]  ;;  %v242_v33 = vld [vmem:[%s706_s5 + $0x20] sm:$0xff]  ;;  %v241_v41 = vld [vmem:[%s706_s5 + $0x18] sm:$0xff] }
  0x1a   :  { %423 = vmatpush3.msra.mxu1 %v149_v10  ;;  %451 = vmatprep.subr.mxu0 %v252_v23  ;;  %v356_v34 = vld [vmem:[%s703_s2] ss:$0 sm:$0xff]  ;;  %v240_v42 = vld [vmem:[%s706_s5 + $0x10] sm:$0xff]  ;;  %v239_v43 = vld [vmem:[%s706_s5 + $0x8] sm:$0xff] }
  0x1b   :  { %424 = vmatprep.subr.mxu1 %v148_v11  ;;  %452 = vmatpush3.msra.mxu0 %v252_v23  ;;  %v238_v44 = vld [vmem:[%s706_s5] sm:$0xff]  ;;  %s535_s5 = smov [#allocation5]  }
  0x1c   :  { %425 = vmatpush3.msra.mxu1 %v148_v11  ;;  %453 = vmatprep.subr.mxu0 %v251_v24  ;;  %v359_v45 = vld [vmem:[%s705_s4] ss:$0 sm:$0xff]  ;;  %s344_s10 = sshll.u32 %s535_s5, 4  ;;  %s345_s10 = int_to_ptr.vmem [resolvable:$true] %s344_s10 }
  0x1d   :  { %426 = vmatprep.subr.mxu1 %v147_v12  ;;  %454 = vmatpush3.msra.mxu0 %v251_v24  ;;  %v360_v52 = vld [vmem:[%s707_s6] ss:$0 sm:$0xff]  ;;  %s508_s4 = scalar_lea.vmem %s345_s10, 256  ;;  %p513_p6 = scmp.lt.s32.totalorder %s345_s10, %s345_s10 }
  0x1e   :  { %427 = vmatpush3.msra.mxu1 %v147_v12  ;;  %455 = vmatprep.subr.mxu0 %v250_v25  ;;  %p509_p5 = scmp.ne.s32.totalorder %s345_s10, %s508_s4  ;;  %p514_p7 = scmp.lt.s32.totalorder %s508_s4, %s508_s4 }
  0x1f   :  { %428 = vmatprep.subr.mxu1 %v146_v13  ;;  %456 = vmatpush3.msra.mxu0 %v250_v25 }
  0x20   :  { %429 = vmatpush3.msra.mxu1 %v146_v13  ;;  %457 = vmatprep.subr.mxu0 %v249_v26  ;;  %p515_p8 = por %p514_p7, %p513_p6 }
  0x21   :  { %430 = vmatprep.subr.mxu1 %v145_v14  ;;  %458 = vmatpush3.msra.mxu0 %v249_v26 }
  0x22   :  { %431 = vmatpush3.msra.mxu1 %v145_v14  ;;  %459 = vmatprep.subr.mxu0 %v248_v27  ;;  %p516_p9 = pnand %p515_p8, %p509_p5 }
  0x23   :  { %432 = vmatprep.subr.mxu1 %v144_v15  ;;  %460 = vmatpush3.msra.mxu0 %v248_v27 }
  0x24   :  { %433 = vmatpush3.msra.mxu1 %v144_v15  ;;  %461 = vmatprep.subr.mxu0 %v247_v28 }
  0x25   :  { %434 = vmatprep.subr.mxu1 %v143_v16  ;;  %462 = vmatpush3.msra.mxu0 %v247_v28 }
  0x26   :  { %435 = vmatpush3.msra.mxu1 %v143_v16  ;;  %463 = vmatprep.subr.mxu0 %v246_v29 }
  0x27   :  { %436 = vmatprep.subr.mxu1 %v142_v17  ;;  %464 = vmatpush3.msra.mxu0 %v246_v29 }
  0x28   :  { %437 = vmatpush3.msra.mxu1 %v142_v17  ;;  %465 = vmatprep.subr.mxu0 %v245_v30 }
  0x29   :  { %438 = vmatprep.subr.mxu1 %v141_v18  ;;  %466 = vmatpush3.msra.mxu0 %v245_v30 }
  0x2a   :  { %439 = vmatpush3.msra.mxu1 %v141_v18  ;;  %467 = vmatprep.subr.mxu0 %v244_v31 }
  0x2b   :  { %440 = vmatprep.subr.mxu1 %v140_v19  ;;  %468 = vmatpush3.msra.mxu0 %v244_v31 }
  0x2c   :  { %441 = vmatpush3.msra.mxu1 %v140_v19  ;;  %469 = vmatprep.subr.mxu0 %v243_v32 }
  0x2d   :  { %442 = vmatprep.subr.mxu1 %v139_v20  ;;  %470 = vmatpush3.msra.mxu0 %v243_v32 }
  0x2e   :  { %443 = vmatpush3.msra.mxu1 %v139_v20  ;;  %471 = vmatprep.subr.mxu0 %v242_v33 }
  0x2f   :  { %444 = vmatprep.subr.mxu1 %v138_v21  ;;  %472 = vmatpush3.msra.mxu0 %v242_v33 }
  0x30   :  { %445 = vmatpush3.msra.mxu1 %v138_v21  ;;  %473 = vmatprep.subr.mxu0 %v241_v41 }
  0x31   :  { %474 = vmatpush3.msra.mxu0 %v241_v41 }
  0x32   :  { %475 = vmatprep.subr.mxu0 %v240_v42 }
  0x33   :  { %476 = vmatpush3.msra.mxu0 %v240_v42 }
  0x34   :  { %477 = vmatprep.subr.mxu0 %v239_v43 }
  0x35   :  { %478 = vmatpush3.msra.mxu0 %v239_v43 }
  0x36   :  { %479 = vmatprep.subr.mxu0 %v238_v44 }
  0x37   :  { %480 = vmatpush3.msra.mxu0 %v238_v44 }
  0xd7   :  { %v413_v35 = vpop.f32.mrf.mxu0 }
  0xd8   :  { %v133_v36 = vadd.f32 %v413_v35, %v356_v34 }
  0xd9   :  { %v127_v37 = vpop.f32.mrf.mxu0 }
  0xda   :  { %v128_v38 = vadd.f32 %v356_v34, %v127_v37  ;;  %v137_v40 = vmax.f32 %v133_v36, 0.0 }
  0xdc   :  { %v136_v39 = vmax.f32 %v128_v38, 0.0 }
  0xde   :  { %446 = vmatprep.mubr.f32.mxu1 %v136_v39 }
  0xdf   :  { %447 = vmatmul.mubr.f32.vlgmr.msra.gmra.mxu1 %v137_v40 }
 0x19f   :  { %v448_v46 = vpop.f32.mrf.mxu1 }
 0x1a0   :  { %v233_v47 = vadd.f32 %v448_v46, %v359_v45 }
 0x1a1   :  { %v227_v48 = vpop.f32.mrf.mxu1 }
 0x1a2   :  { %v228_v49 = vadd.f32 %v359_v45, %v227_v48  ;;  %v237_v51 = vmax.f32 %v233_v47, 0.0 }
 0x1a4   :  { %v236_v50 = vmax.f32 %v228_v49, 0.0 }
 0x1a6   :  { %481 = vmatprep.mubr.f32.mxu0 %v236_v50 }
 0x1a7   :  { %482 = vmatmul.mubr.f32.vlgmr.msra.gmra.mxu0 %v237_v51 }
 0x267   :  { %v483_v53 = vpop.f32.mrf.mxu0 }
 0x268   :  { %v333_v54 = vadd.f32 %v483_v53, %v360_v52 }
 0x269   :  { %v327_v55 = vpop.f32.mrf.mxu0 }
 0x26a   :  { %v328_v56 = vadd.f32 %v360_v52, %v327_v55  ;;  %338 = vst.msk [vmem:[#allocation5 + $0x8] sm:$0xff] %vm336_vm1, %v333_v54 }
 0x26c   :  { %337 = vst.msk [vmem:[#allocation5] sm:$0xff] %vm336_vm1, %v328_v56 }
 0x26d   :  { %519 = shalt.err (!%p516_p9)
}
 0x26e   :  { %350 = dma.vmem_to_hbm [thread:$0]  %s345_s10, 256, %s708_s7, [#allocation4], %s533_s27, %s533_s27, %s534_s28  }
 0x26f   :  { %530 = dma.done.wait [#allocation4], 256  }
 0x270   :  { %531 = vsyncadd [#allocation4], 4294967040 }
 0x271   :  { %354 = vsyncpa [#allocation3], 1 }
 0x272   :  { %355 = vsyncpa [#allocation4], 1 }

</bundles_post_ra>
